<compile_context>
chip_gen: v6e
topology: v6e:2x2x1
jax: 0.10.0
libtpu: 0.0.40
codegen_flags: <defaults>
</compile_context>

<pallas_src>
import jax
import jax.numpy as jnp
from jax.experimental import pallas as pl
from jax.experimental.pallas import tpu as pltpu

_LANE = 128
_TARGET_INPUT_BLOCK_BYTES = 2 * 1024 * 1024   # -> ~12 MiB pipelined footprint


def _sublane_multiple(dtype) -> int:
    # f32 -> 8, bf16 -> 16, int8/fp8 -> 32 (rows pack along sublanes).
    itemsize = jnp.dtype(dtype).itemsize
    return max(8, 8 * (4 // max(itemsize, 1)))


def _pick_tile_rows(r: int, sub: int, target: int) -> int:
    """Largest row tile <= target, sublane-aligned; prefer exact divisors of r."""
    if r <= target:
        return r                       # full extent: always legal, no masking
    t = max(sub, (target // sub) * sub)
    for cand in range(t, 0, -sub):     # prefer a divisor -> no partial block
        if r % cand == 0:
            return cand
    return t                           # partial last block (Pallas masks stores)


def _split_on_off_kernel(x_ref, o_ref):
    # x_ref: (1, TR, L)    o_ref: (1, 2, TR, L)
    x = x_ref[...]
    half = jnp.asarray(0.5, dtype=x.dtype)
    zero = jnp.asarray(0.0, dtype=x.dtype)
    o_ref[:, 0] = jnp.maximum(x - half, zero)   # "on"  half: relu(x - 0.5)
    o_ref[:, 1] = jnp.maximum(half - x, zero)   # "off" half: relu(0.5 - x)


def _run_lane_dense(x2d: jax.Array) -> jax.Array:
    """x2d: (B, N) with N % 128 == 0.  Returns (B, 2, N)."""
    b, n = x2d.shape
    lane_l = _LANE
    for cand in (2048, 1024, 512, 256, 128):
        if n % cand == 0:
            lane_l = cand
            break
    r = n // lane_l

    dtype = x2d.dtype
    itemsize = jnp.dtype(dtype).itemsize
    sub = _sublane_multiple(dtype)
    target_rows = max(sub, _TARGET_INPUT_BLOCK_BYTES // (lane_l * itemsize))
    tile_r = _pick_tile_rows(r, sub, target_rows)

    x3 = x2d.reshape(b, r, lane_l)                      # metadata-only
    grid = (b, pl.cdiv(r, tile_r))

    out = pl.pallas_call(
        _split_on_off_kernel,
        out_shape=jax.ShapeDtypeStruct((b, 2, r, lane_l), dtype),
        grid=grid,
        in_specs=[pl.BlockSpec((1, tile_r, lane_l), lambda i, j: (i, j, 0))],
        out_specs=pl.BlockSpec(
            (1, 2, tile_r, lane_l), lambda i, j: (i, 0, j, 0)
        ),
        compiler_params=pltpu.CompilerParams(
            dimension_semantics=("parallel", "parallel"),
        ),
    )(x3)
    return out.reshape(b, 2, n)


def split_on_off(x: jax.Array) -> jax.Array:
    assert x.ndim == 4, "expected NCHW 4-D input"
    b, c, h, w = x.shape
    n = c * h * w

    x2d = x.reshape(b, n)                               # metadata-only
    pad = (-n) % _LANE
    if pad:
        # TODO(synk): ragged tail (C*H*W % 128 != 0) — pad/slice costs one extra
        # XLA pass of HBM traffic; acceptable for this rare fallback and still
        # much better than masked sub-128-lane stores.
        x2d = jnp.pad(x2d, ((0, 0), (0, pad)))

    out = _run_lane_dense(x2d)                          # (B, 2, N + pad)
    if pad:
        out = out[:, :, :n]
    # (B, 2, C*H*W) -> (B, 2C, H, W): per batch, first C*H*W elems are "on",
    # next C*H*W are "off" — exactly torch.cat along the channel dim.
    return out.reshape(b, 2 * c, h, w)


def _reference(x: jnp.ndarray) -> jnp.ndarray:
    t = x - jnp.asarray(0.5, dtype=x.dtype)
    zero = jnp.asarray(0.0, dtype=x.dtype)
    return jnp.concatenate([jnp.maximum(t, zero), jnp.maximum(-t, zero)], axis=1)


if __name__ == "__main__":
    key = jax.random.PRNGKey(0)
    k0, k1, k2, k3 = jax.random.split(key, 4)

    # Primary shape implied by the module (B=2, C=4, H=W=16).
    x = jax.random.uniform(k0, (2, 4, 16, 16), dtype=jnp.float32)
    out = jax.block_until_ready(split_on_off(x))
    assert out.shape == (2, 8, 16, 16) and out.dtype == x.dtype
    assert jnp.allclose(out, _reference(x), atol=1e-6), "mismatch (primary)"

    # Lane-dense path with multiple rows per batch (L=2048 branch).
    x2 = jax.random.uniform(k1, (2, 8, 32, 128), dtype=jnp.float32)
    out2 = jax.block_until_ready(split_on_off(x2))
    assert out2.shape == (2, 16, 32, 128)
    assert jnp.allclose(out2, _reference(x2), atol=1e-6), "mismatch (tiled)"

    # Ragged fallback: C*H*W not a multiple of 128 (pad/slice path).
    x3 = jax.random.uniform(k2, (2, 3, 5, 7), dtype=jnp.float32)
    out3 = jax.block_until_ready(split_on_off(x3))
    assert out3.shape == (2, 6, 5, 7)
    assert jnp.allclose(out3, _reference(x3), atol=1e-6), "mismatch (ragged)"

    # bf16 path (sublane packing = 16), no in-kernel upcast.
    x4 = jax.random.uniform(k3, (2, 4, 16, 16), dtype=jnp.bfloat16)
    out4 = jax.block_until_ready(split_on_off(x4))
    assert out4.shape == (2, 8, 16, 16) and out4.dtype == jnp.bfloat16
    assert jnp.allclose(out4.astype(jnp.float32),
                        _reference(x4).astype(jnp.float32),
                        atol=1e-2), "mismatch (bf16)"

    print("KERNEL_OK")
</pallas_src>

<mosaic_0001>
module attributes {stable_mosaic.version = 11 : i64} {
  func.func @_split_on_off_kernel(%arg0: i32, %arg1: i32, %arg2: memref<1x1x1024xf32, #tpu.memory_space<vmem>>, %arg3: memref<1x2x1x1024xf32, #tpu.memory_space<vmem>>) attributes {dimension_semantics = [#tpu.dimension_semantics<parallel>, #tpu.dimension_semantics<parallel>], iteration_bounds = array<i64: 2, 1>, scalar_prefetch = 0 : i64, scratch_operands = 0 : i64, tpu.core_type = #tpu.core_type<tc>, window_params = [{transform_indices = @transform_0, window_bounds = array<i64: 1, 1, 1024>}, {transform_indices = @transform_1, window_bounds = array<i64: 1, 2, 1, 1024>}]} {
    %c0 = arith.constant 0 : index
    %c0_0 = arith.constant 0 : index
    %c0_1 = arith.constant 0 : index
    %0 = vector.load %arg2[%c0, %c0_0, %c0_1] : memref<1x1x1024xf32, #tpu.memory_space<vmem>>, vector<1x1x1024xf32>
    %cst = arith.constant 5.000000e-01 : f32
    %1 = vector.broadcast %cst : f32 to vector<1x1x1024xf32>
    %2 = arith.subf %0, %1 : vector<1x1x1024xf32>
    %cst_2 = arith.constant 0.000000e+00 : f32
    %3 = vector.broadcast %cst_2 : f32 to vector<1x1x1024xf32>
    %4 = arith.maximumf %2, %3 : vector<1x1x1024xf32>
    %c0_3 = arith.constant 0 : index
    %c0_4 = arith.constant 0 : index
    %c0_5 = arith.constant 0 : index
    %c0_6 = arith.constant 0 : index
    %5 = vector.load %arg3[%c0_3, %c0_4, %c0_5, %c0_6] : memref<1x2x1x1024xf32, #tpu.memory_space<vmem>>, vector<1x1x1x1024xf32>
    %6 = vector.shape_cast %5 : vector<1x1x1x1024xf32> to vector<1x1x1024xf32>
    %7 = vector.shape_cast %4 : vector<1x1x1024xf32> to vector<1x1x1x1024xf32>
    tpu.vector_store %arg3[%c0_3, %c0_4, %c0_5, %c0_6], %7 {strides = array<i32>} : memref<1x2x1x1024xf32, #tpu.memory_space<vmem>>, vector<1x1x1x1024xf32>,
    %cst_7 = arith.constant 5.000000e-01 : f32
    %8 = vector.broadcast %cst_7 : f32 to vector<1x1x1024xf32>
    %9 = arith.subf %8, %0 : vector<1x1x1024xf32>
    %cst_8 = arith.constant 0.000000e+00 : f32
    %10 = vector.broadcast %cst_8 : f32 to vector<1x1x1024xf32>
    %11 = arith.maximumf %9, %10 : vector<1x1x1024xf32>
    %c0_9 = arith.constant 0 : index
    %c1 = arith.constant 1 : index
    %c0_10 = arith.constant 0 : index
    %c0_11 = arith.constant 0 : index
    %12 = vector.load %arg3[%c0_9, %c1, %c0_10, %c0_11] : memref<1x2x1x1024xf32, #tpu.memory_space<vmem>>, vector<1x1x1x1024xf32>
    %13 = vector.shape_cast %12 : vector<1x1x1x1024xf32> to vector<1x1x1024xf32>
    %14 = vector.shape_cast %11 : vector<1x1x1024xf32> to vector<1x1x1x1024xf32>
    tpu.vector_store %arg3[%c0_9, %c1, %c0_10, %c0_11], %14 {strides = array<i32>} : memref<1x2x1x1024xf32, #tpu.memory_space<vmem>>, vector<1x1x1x1024xf32>,
    return
  }
  func.func @transform_0(%arg0: i32, %arg1: i32) -> (i32, i32, i32) {
    %c0_i32 = arith.constant 0 : i32
    %c0_i32_0 = arith.constant 0 : i32
    return %arg0, %arg1, %c0_i32 : i32, i32, i32
  }
  func.func @transform_1(%arg0: i32, %arg1: i32) -> (i32, i32, i32, i32) {
    %c0_i32 = arith.constant 0 : i32
    %c0_i32_0 = arith.constant 0 : i32
    %c0_i32_1 = arith.constant 0 : i32
    return %arg0, %c0_i32, %arg1, %c0_i32_0 : i32, i32, i32, i32
  }
}

</mosaic_0001>

<bundles_post_ra>
// kernel: tpu_custom_call.1
= control target key start
LH: loop header
LB: loop body
LE: loop exit
PB: predicated region body
PF: predicated region fallthrough
CT: control target
= control target key end

     0   :  { %6 = vsyncpa [#allocation3], 0  ;;  %s618_s0 = inlined_call_operand.hbm [shape: f32[2,1,1024], index: 0, kind: input, shape index: {}]   ;;  %s619_s1 = inlined_call_operand.hbm [shape: f32[2,2,1,1024], index: 1, kind: output, shape index: {}]  }
   0x1   :  { %8 = vsyncpa [#allocation3 + $0x1], 0 }
   0x2   :  { %9 = vsyncpa [#allocation4], 0 }
   0x3   :  { %11 = vsyncpa [#allocation4 + $0x1], 0  ;;  %s469_s6 = smov 0   ;;  %s471_s7 = smov 0  }
   0x4   :  { %s473_s8 = smov 0   ;;  %s475_s9 = smov 0  }
   0x5   :  { %s477_s10 = smov 0   ;;  %s479_s11 = smov 0  }
   0x6 LB: > { %s262_s12 = sadd.s32 4294967295, %s453_s11   ;;  %s263_s13 = sadd.s32 4294967294, %s453_s11   ;;  %s453_s11 = sphi %s479_s11, %s17_s11   ;;  %s449_s10 = sphi %s477_s10, %s631_s10   ;;  %s445_s9 = sphi %s475_s9, %s630_s9   ;;  %s441_s8 = sphi %s473_s8, %s629_s8   ;;  %s437_s7 = sphi %s471_s7, %s628_s7   ;;  %s433_s6 = sphi %s469_s6, %s627_s6  }
   0x7   : > { %s29_s14 = sadd.s32 1, %s449_s10  ;;  %s38_s15 = sadd.s32 1, %s441_s8 }
   0x8   : > { %p31_p0 = scmp.ge.s32.totalorder %s29_s14, 2  ;;  %p45_p1 = scmp.ne.s32.totalorder %s441_s8, %s437_s7 }
   0x9   : > { %p46_p2 = scmp.eq.s32.totalorder %s453_s11, 0  ;;  %p51_p3 = scmp.ne.s32.totalorder %s437_s7, %s433_s6 }
   0xa   : > { %s633_s14 = smov (%p31_p0, %s29_s14), 0  ;;  %p52_p5 = scmp.eq.s32.totalorder %s262_s12, 0 }
   0xb   : > { %p510_p4 = por %p46_p2, %p45_p1  ;;  %s33_s17 = ssub.s32 %s449_s10, %s633_s14 }
   0xc   : > { %p77_p6 = scmp.eq.s32.totalorder %s262_s12, 1  ;;  %p36_p7 = scmp.eq.s32.totalorder %s33_s17, 0 }
   0xd   : > { %p516_p8 = por %p52_p5, %p51_p3  ;;  %p83_p10 = scmp.eq.s32.totalorder %s263_s13, 1 }
   0xe   : > { %p520_p9 = por %p77_p6, %p45_p1  ;;  %p293_p13 = scmp.lt.s32.totalorder %s453_s11, 2 }
   0xf   : > { %s525_s20 = scalar_select %p36_p7, %s441_s8, %s38_s15  }
  0x10   : > { %p527_p11 = por %p83_p10, %p51_p3  ;;  %s103_s22 = sand.u32 1, %s441_s8  }
  0x11   : > { %s266_s23 = sshll.u32 %s103_s22, 3  ;;  %s279_s24 = sshll.u32 %s449_s10, 7 }
  0x12   : > { %s623_s21 = scalar_select %p527_p11, 1, 0 }
  0x13   : > { %s115_s27 = scalar_lea.hbm %s618_s0, %s279_s24  ;;  %s107_s28 = scalar_lea.vmem [#allocation2], %s266_s23 }
  0x14   : > { %s117_s29 = sshll.u32 %s107_s28, 4  ;;  %p540_p0 = pnand %p293_p13, %p510_p4  ;;  %s118_s29 = int_to_ptr.vmem [resolvable:$true] %s117_s29 }
  0x15   : > { %p269_p1 = scmp.ge.s32.totalorder %s453_s11, 1  ;;  %p122_p2 = scmp.lt.s32.totalorder %s453_s11, 3 }
  0x16   : > { %s104_s2 = scalar_lea.sflag [#allocation3], %s103_s22  ;;  %p347_p3 = pneg %p540_p0 }
  0x17   : > { %s358_s3 = scalar_lea.vmem %s118_s29, 128  ;;  %s455_s4 = smov [#allocation2]  }
  0x18   : > { %p359_p5 = scmp.ne.s32.totalorder %s118_s29, %s358_s3  ;;  %s363_s5 = sshll.u32 %s455_s4, 4  ;;  %s364_s5 = int_to_ptr.vmem [resolvable:$false] %s363_s5 }
  0x19   : > { %s365_s12 = scalar_lea.vmem %s364_s5, 256  ;;  %p366_p10 = scmp.lt.s32.totalorder %s118_s29, %s364_s5 }
  0x1a   : > { %p361_p6 = pnand %p359_p5, %p347_p3  ;;  %p367_p12 = scmp.lt.s32.totalorder %s365_s12, %s358_s3 }
  0x1c   : > { %p362_p7 = pneg %p361_p6  ;;  %p368_p4 = por %p367_p12, %p366_p10 }
  0x1e   : > { %p369_p13 = pnand %p368_p4, %p362_p7 }
  0x20   : > { %372 = shalt.err (!%p369_p13)
}
  0x21   : > { %288 = dma.hbm_to_vmem [thread:$0]  (!%p540_p0), %s115_s27, 128, %s118_s29, %s104_s2  }
  0x22   : > { %p123_p11 = pnand %p269_p1, %p122_p2 }
  0x23   : > { %s555_s13 = sand.u32 (!%p123_p11), 1, %s437_s7  }
  0x24   : > { %126 = sbr.rel (%p123_p11) target bundleno = 67 (0x43), region = 24  ;;  %s270_s15 = sshll.u32 (!%p123_p11), %s555_s13, 3 }
  0x25   : > { %s129_s16 = scalar_lea.sflag (!%p123_p11), [#allocation3], %s555_s13  ;;  %s132_s17 = scalar_lea.vmem (!%p123_p11), [#allocation2], %s270_s15 }
  0x29   : > { %424 = dma.done.wait (%p516_p8), %s129_s16, 128  }
  0x2a   : > { %426 = vsyncadd (%p516_p8), %s129_s16, 4294967168  ;;  %s271_s22 = sshll.u32 %s555_s13, 4  ;;  %s280_s25 = sshll.u32 %s445_s9, 8  ;;  %v151_v0 = vld [vmem:[%s132_s17] sm:$0xff] }
  0x2b   : > { %s150_s23 = scalar_lea.vmem [#allocation5], %s271_s22  ;;  %v272_v1 = vadd.f32 -0.5, %v151_v0  ;;  %v155_v2 = vsub.f32 0.5, %v151_v0  ;;  %s570_s18 = scalar_lea.hbm %s619_s1, %s280_s25 }
  0x2c   : > { %s175_s24 = sshll.u32 %s150_s23, 4  ;;  %s160_s28 = scalar_lea.sflag [#allocation4], %s555_s13  ;;  %s565_s24 = int_to_ptr.vmem [resolvable:$true] %s175_s24 }
  0x2d   : > { %v153_v3 = vmax.f32 %v272_v1, 0.0  ;;  %v156_v4 = vmax.f32 %v155_v2, 0.0  ;;  %s373_s29 = scalar_lea.vmem %s565_s24, 256  ;;  %s456_s9 = smov [#allocation5]  }
  0x2e   : > { %p374_p8 = scmp.ne.s32.totalorder %s565_s24, %s373_s29  ;;  %s377_s30 = sshll.u32 %s456_s9, 4  ;;  %s378_s30 = int_to_ptr.vmem [resolvable:$false] %s377_s30 }
  0x2f   : > { %154 = vst [vmem:[%s150_s23] sm:$0xff] %v153_v3  ;;  %273 = vst [vmem:[%s150_s23 + $0x8] sm:$0xff] %v156_v4  ;;  %s379_s2 = scalar_lea.vmem %s378_s30, 512  ;;  %p380_p0 = scmp.lt.s32.totalorder %s565_s24, %s378_s30 }
  0x30   : > { %p375_p11 = pnand %p374_p8, %p520_p9  ;;  %p381_p1 = scmp.lt.s32.totalorder %s379_s2, %s373_s29 }
  0x32   : > { %p376_p12 = pneg %p375_p11  ;;  %p382_p2 = por %p381_p1, %p380_p0 }
  0x34   : > { %p383_p3 = pnand %p382_p2, %p376_p12 }
  0x36   : > { %386 = shalt.err (!%p383_p3)
}
  0x37   : > { %s387_s3 = scalar_lea.hbm %s570_s18, 256  ;;  %s391_s12 = scalar_lea.hbm %s619_s1, 512 }
  0x38   : > { %p388_p5 = scmp.ne.s32.totalorder %s570_s18, %s387_s3  ;;  %p392_p10 = scmp.lt.s32.totalorder %s570_s18, %s619_s1 }
  0x39   : > { %p393_p4 = scmp.lt.s32.totalorder %s391_s12, %s387_s3 }
  0x3a   : > { %p389_p6 = pnand %p388_p5, %p520_p9 }
  0x3b   : > { %p394_p13 = por %p393_p4, %p392_p10 }
  0x3c   : > { %p390_p7 = pneg %p389_p6 }
  0x3e   : > { %p395_p8 = pnand %p394_p13, %p390_p7 }
  0x40   : > { %398 = shalt.err (!%p395_p8)
}
  0x41   : > { %s457_s17 = smov 128   ;;  %s458_s22 = smov 8  }
  0x42   : > { %283 = dma.vmem_to_hbm [thread:$0]  (%p520_p9), %s565_s24, 256, %s570_s18, %s160_s28, %s457_s17, %s457_s17, %s458_s22  }
  0x43 PF: > { %s190_s23 = sand.u32 1, %s433_s6   ;;  %p625_p11 = scmp.ne.s32.totalorder %s623_s21, 0 }
  0x44   : > { %p626_p12 = scmp.ge.s32.totalorder %s453_s11, 2  ;;  %s191_s25 = scalar_lea.sflag [#allocation4], %s190_s23 }
  0x46   : > { %p290_p0 = pnand %p626_p12, %p625_p11 }
  0x48   : > { %p291_p1 = pneg %p290_p0 }
  0x4a   : > { %428 = dma.done.wait (%p291_p1), %s191_s25, 256  }
  0x4b   : > { %430 = vsyncadd (%p291_p1), %s191_s25, 4294967040  ;;  %s17_s11 = sadd.s32 1, %s453_s11   ;;  %s627_s6 = smov %s437_s7 }
  0x4c   : > { %p14_p2 = scmp.ge.s32.totalorder %s17_s11, 4   ;;  %s628_s7 = smov %s441_s8 }
  0x4d   : > { %s629_s8 = smov %s525_s20  ;;  %s630_s9 = smov %s449_s10 }
  0x4e   : > { %s631_s10 = smov %s633_s14  ;;  %16 = sbr.rel (!%p14_p2) target bundleno = 6 (0x6), region = 70 }
  0x53   :  { %196 = vsyncpa [#allocation3], 1 }
  0x54   :  { %198 = vsyncpa [#allocation3 + $0x1], 1 }
  0x55   :  { %199 = vsyncpa [#allocation4], 1 }
  0x56   :  { %201 = vsyncpa [#allocation4 + $0x1], 1 }

</bundles_post_ra>
